<compile_context>
chip_gen: v5e
topology: v5e:2x2
jax: 0.10.0
libtpu: 0.0.40
codegen_flags: <defaults>
</compile_context>

<pallas_src>
import math

import jax
import jax.numpy as jnp
from jax import lax
from jax.experimental import pallas as pl
from jax.experimental.pallas import tpu as pltpu


NEG_LARGE = -1000000.0  # matches masked_softmax's fill value


def _round_up(x: int, m: int) -> int:
    return ((x + m - 1) // m) * m


def _vmem_budget_bytes() -> int:
    """~80% of this generation's physical VMEM (fallback: 64 MiB)."""
    try:
        cap = int(pltpu.get_tpu_info().vmem_capacity_bytes)
    except Exception:
        cap = 64 << 20
    return max(int(cap * 0.8), 32 << 20)


def _pick_q_tile(tq_full: int, cap: int, align: int) -> int:
    """Aligned query tile <= cap; caller pads Tq up to a multiple of it."""
    if tq_full <= cap:
        return _round_up(tq_full, align)
    for cand in range(cap, align - 1, -align):
        if tq_full % cand == 0:
            return cand
    return cap  # no aligned divisor: pad Tq up to a multiple of `cap`


def _pick_kv_tile(tk_full: int) -> int:
    for cand in (512, 384, 256, 128):
        if tk_full % cand == 0:
            return cand
    return 512  # pad Tk up to a multiple of 512


def _make_single_pass_kernel(return_attn: bool, approx_recip: bool):
    """Per-(batch, query-tile) kernel; whole K / V||L resident in VMEM."""

    def kernel(vl_ref, qw_ref, k_ref, vlab_ref, out_ref, *rest):
        b = pl.program_id(0)

        qw = qw_ref[0]        # (tq, d)   already scaled by 1/sqrt(d)
        k = k_ref[0]          # (Tk, d)
        vlab = vlab_ref[0]    # (Tk, dvl_p)

        # Contract last-dim vs last-dim: feeds the MXU with no in-kernel transpose.
        scores = lax.dot_general(
            qw, k, dimension_numbers=(((1,), (1,)), ((), ())),
            preferred_element_type=jnp.float32)               # (tq, Tk) f32

        valid = vl_ref[b]
        col = lax.broadcasted_iota(jnp.int32, scores.shape, 1)
        scores = jnp.where(col < valid, scores, jnp.float32(NEG_LARGE))

        m = jnp.max(scores, axis=-1, keepdims=True)
        p = jnp.exp(scores - m)
        denom = jnp.sum(p, axis=-1, keepdims=True)
        attn = p * pl.reciprocal(denom, approx=approx_recip)

        out = lax.dot_general(
            attn.astype(vlab.dtype), vlab,
            dimension_numbers=(((1,), (0,)), ((), ())),
            preferred_element_type=jnp.float32)               # (tq, dvl_p)
        out_ref[0] = out.astype(out_ref.dtype)

        if return_attn:
            rest[0][0] = attn.astype(rest[0].dtype)

    return kernel


def _make_flash_kernel(tk: int, approx_recip: bool):
    """Per-(batch, query-tile, kv-tile) online-softmax kernel."""

    def kernel(vl_ref, qw_ref, k_ref, vlab_ref, out_ref, m_sc, l_sc, acc_sc):
        b = pl.program_id(0)
        kv = pl.program_id(2)

        @pl.when(kv == 0)
        def _():
            m_sc[...] = jnp.full_like(m_sc, -jnp.inf)
            l_sc[...] = jnp.zeros_like(l_sc)
            acc_sc[...] = jnp.zeros_like(acc_sc)

        qw = qw_ref[0]        # (tq, d)   already scaled by 1/sqrt(d)
        k = k_ref[0]          # (tk, d)
        vlab = vlab_ref[0]    # (tk, dvl_p)

        s = lax.dot_general(
            qw, k, dimension_numbers=(((1,), (1,)), ((), ())),
            preferred_element_type=jnp.float32)               # (tq, tk) f32

        valid = vl_ref[b]
        col = kv * tk + lax.broadcasted_iota(jnp.int32, s.shape, 1)
        s = jnp.where(col < valid, s, jnp.float32(NEG_LARGE))

        m_prev = m_sc[...]
        m_new = jnp.maximum(m_prev, jnp.max(s, axis=-1, keepdims=True))
        alpha = jnp.exp(m_prev - m_new)
        p = jnp.exp(s - m_new)
        l_sc[...] = alpha * l_sc[...] + jnp.sum(p, axis=-1, keepdims=True)
        acc_sc[...] = alpha * acc_sc[...] + lax.dot_general(
            p.astype(vlab.dtype), vlab,
            dimension_numbers=(((1,), (0,)), ((), ())),
            preferred_element_type=jnp.float32)
        m_sc[...] = m_new

        @pl.when(kv == pl.num_programs(2) - 1)
        def _():
            out_ref[0] = (acc_sc[...]
                          * pl.reciprocal(l_sc[...], approx=approx_recip)
                          ).astype(out_ref.dtype)

    return kernel


def dot_product_attention(queries, keys, values, labels, weight, valid_lens=None,
                          *, compute_dtype=jnp.bfloat16,
                          return_attention_weights=False,
                          attn_weights_dtype=jnp.bfloat16,
                          approx_reciprocal=True,
                          q_tile=None, kv_tile=None,
                          single_pass_max_tk=1024):
    """Pallas implementation of DotProductAttention.forward.

    Returns (attn @ values, attn @ labels[, attention_weights]).
    Note: approx_reciprocal=True uses the EUP approximate reciprocal, so softmax
    rows sum to 1 only to ~1e-3; pass False for the exact path.
    """
    B, Tq, d = queries.shape
    _, Tk, _ = keys.shape
    dv = values.shape[-1]
    dl = labels.shape[-1]
    dvl = dv + dl

    if valid_lens is not None and valid_lens.ndim != 1:
        # TODO(synk): 2-D per-query valid_lens (accepted by masked_softmax) are
        # not implemented; reject rather than silently mis-masking.
        raise NotImplementedError("only None or shape-(B,) valid_lens supported")

    # nn.Linear(d, d, bias=False) with 1/sqrt(d) folded into the weight: one
    # well-shaped XLA matmul, and no per-step (tq, Tk) scale pass in the kernel.
    scaled_w = (weight * jnp.float32(1.0 / math.sqrt(d))).astype(jnp.float32)
    qw = jnp.einsum("btd,ed->bte", queries.astype(jnp.float32), scaled_w)
    qw = qw.astype(compute_dtype)

    # Fuse values||labels and pad the lane dim to a multiple of 128 so the
    # attn @ [V||L] matmul and its store are lane-dense (unmasked vst).
    vlab = jnp.concatenate([values, labels], axis=-1)
    dvl_p = _round_up(dvl, 128)
    if dvl_p != dvl:
        vlab = jnp.pad(vlab, ((0, 0), (0, 0), (0, dvl_p - dvl)))
    vlab = vlab.astype(compute_dtype)
    k_c = keys.astype(compute_dtype)

    if valid_lens is None:
        vlen = jnp.full((B,), Tk, dtype=jnp.int32)
    else:
        vlen = valid_lens.astype(jnp.int32)

    itemsize = jnp.dtype(compute_dtype).itemsize
    row_align = 8 * (4 // itemsize)        # 8 for f32, 16 for bf16 (sublane packing)
    use_flash = (not return_attention_weights) and (Tk > single_pass_max_tk)

    # Query tile: dtype-aware alignment; pad Tq rather than emit a huge block.
    cap = 256 if (use_flash or Tk <= 2048) else 128
    tq = q_tile if q_tile is not None else _pick_q_tile(Tq, cap, row_align)
    Tq_p = _round_up(Tq, tq)
    if Tq_p != Tq:
        qw = jnp.pad(qw, ((0, 0), (0, Tq_p - Tq), (0, 0)))
    num_q = Tq_p // tq

    budget = _vmem_budget_bytes()
    qi_sem = "parallel" if B == 1 else "arbitrary"   # batch-biased megacore split

    if use_flash:
        tk = kv_tile if kv_tile is not None else _pick_kv_tile(Tk)
        Tk_p = _round_up(Tk, tk)
        if Tk_p != Tk:
            pad = Tk_p - Tk
            k_c = jnp.pad(k_c, ((0, 0), (0, pad), (0, 0)))
            vlab = jnp.pad(vlab, ((0, 0), (0, pad), (0, 0)))
        num_kv = Tk_p // tk

        kernel = _make_flash_kernel(tk, approx_reciprocal)
        grid = (B, num_q, num_kv)
        in_specs = [
            pl.BlockSpec((1, tq, d), lambda b, qi, kv, vl: (b, qi, 0)),
            pl.BlockSpec((1, tk, d), lambda b, qi, kv, vl: (b, kv, 0)),
            pl.BlockSpec((1, tk, dvl_p), lambda b, qi, kv, vl: (b, kv, 0)),
        ]
        out_specs = (pl.BlockSpec((1, tq, dvl_p), lambda b, qi, kv, vl: (b, qi, 0)),)
        out_shapes = (jax.ShapeDtypeStruct((B, Tq_p, dvl_p), jnp.float32),)
        scratch = (pltpu.VMEM((tq, 1), jnp.float32),
                   pltpu.VMEM((tq, 1), jnp.float32),
                   pltpu.VMEM((tq, dvl_p), jnp.float32))
        dim_sem = ("parallel", qi_sem, "arbitrary")

        blk_bytes = (2 * ((tq * d + tk * d + tk * dvl_p) * itemsize + tq * dvl_p * 4)
                     + 6 * tq * tk * 4                 # live (tq, tk) f32 temporaries
                     + (2 * tq + tq * dvl_p) * 4)      # scratch accumulators
        flops = 2 * B * Tq_p * Tk_p * (d + dvl_p)
        transcend = B * Tq_p * Tk_p
        bytes_accessed = (B * Tq_p * d * itemsize
                          + B * num_q * Tk_p * (d + dvl_p) * itemsize
                          + B * Tq_p * dvl_p * 4)
    else:
        kernel = _make_single_pass_kernel(return_attention_weights, approx_reciprocal)
        grid = (B, num_q)
        in_specs = [
            pl.BlockSpec((1, tq, d), lambda b, qi, vl: (b, qi, 0)),
            pl.BlockSpec((1, Tk, d), lambda b, qi, vl: (b, 0, 0)),
            pl.BlockSpec((1, Tk, dvl_p), lambda b, qi, vl: (b, 0, 0)),
        ]
        out_specs = [pl.BlockSpec((1, tq, dvl_p), lambda b, qi, vl: (b, qi, 0))]
        out_shapes = [jax.ShapeDtypeStruct((B, Tq_p, dvl_p), jnp.float32)]
        scratch = ()
        dim_sem = ("parallel", qi_sem)
        aw_item = jnp.dtype(attn_weights_dtype).itemsize
        if return_attention_weights:
            out_specs.append(pl.BlockSpec((1, tq, Tk), lambda b, qi, vl: (b, qi, 0)))
            out_shapes.append(jax.ShapeDtypeStruct((B, Tq_p, Tk), attn_weights_dtype))
        out_specs = tuple(out_specs)
        out_shapes = tuple(out_shapes)

        blk_bytes = (2 * ((tq * d + Tk * d + Tk * dvl_p) * itemsize
                          + tq * dvl_p * 4
                          + (tq * Tk * aw_item if return_attention_weights else 0))
                     + 6 * tq * Tk * 4)                # live (tq, Tk) f32 temporaries
        flops = 2 * B * Tq_p * Tk * (d + dvl_p)
        transcend = B * Tq_p * Tk
        bytes_accessed = (B * Tq_p * d * itemsize
                          + B * num_q * Tk * (d + dvl_p) * itemsize
                          + B * Tq_p * dvl_p * 4
                          + (B * Tq_p * Tk * aw_item if return_attention_weights else 0))

    vmem_limit = int(min(max(blk_bytes + (8 << 20), 32 << 20), budget))

    try:
        cost = pl.CostEstimate(flops=int(flops),
                               transcendentals=int(transcend),
                               bytes_accessed=int(bytes_accessed))
    except Exception:
        cost = None

    grid_spec = pltpu.PrefetchScalarGridSpec(
        num_scalar_prefetch=1,
        grid=grid,
        in_specs=in_specs,
        out_specs=out_specs,
        scratch_shapes=scratch,
    )

    results = pl.pallas_call(
        kernel,
        out_shape=out_shapes,
        grid_spec=grid_spec,
        compiler_params=pltpu.CompilerParams(
            dimension_semantics=dim_sem,
            vmem_limit_bytes=vmem_limit,
        ),
        cost_estimate=cost,
    )(vlen, qw, k_c, vlab)

    fused = results[0][:, :Tq, :]
    out_v = fused[..., :dv]
    out_l = fused[..., dv:dvl]
    if return_attention_weights:
        return out_v, out_l, results[1][:, :Tq, :]
    return out_v, out_l


def _reference(queries, keys, values, labels, weight, valid_lens):
    """Plain-JAX reference mirroring the PyTorch module."""
    d = queries.shape[-1]
    qw = jnp.einsum("btd,ed->bte", queries, weight)            # nn.Linear: q @ W^T
    scores = jnp.einsum("bqd,bkd->bqk", qw, keys) / math.sqrt(d)
    if valid_lens is not None:
        Tk = keys.shape[1]
        mask = jnp.arange(Tk)[None, None, :] < valid_lens[:, None, None]
        scores = jnp.where(mask, scores, NEG_LARGE)
    attn = jax.nn.softmax(scores, axis=-1)
    return (jnp.einsum("bqk,bkv->bqv", attn, values),
            jnp.einsum("bqk,bkl->bql", attn, labels),
            attn)


if __name__ == "__main__":
    key = jax.random.PRNGKey(0)
    B, Tq, Tk, d, dv, dl = 2, 8, 8, 32, 32, 16

    kq, kk, kv, kl, kw = jax.random.split(key, 5)
    queries = jax.random.normal(kq, (B, Tq, d), dtype=jnp.float32)
    keys = jax.random.normal(kk, (B, Tk, d), dtype=jnp.float32)
    values = jax.random.normal(kv, (B, Tk, dv), dtype=jnp.float32)
    labels = jax.random.normal(kl, (B, Tk, dl), dtype=jnp.float32)
    bound = 1.0 / math.sqrt(d)
    weight = jax.random.uniform(kw, (d, d), minval=-bound, maxval=bound,
                                dtype=jnp.float32)
    valid_lens = jnp.array([5, 8], dtype=jnp.int32)

    ref_v, ref_l, ref_attn = _reference(queries, keys, values, labels, weight,
                                        valid_lens)

    # 1) f32 single-pass path with exact reciprocal and f32 attention weights
    #    (full module semantics, including the stored attention weights).
    out_v, out_l, attn_w = dot_product_attention(
        queries, keys, values, labels, weight, valid_lens,
        compute_dtype=jnp.float32, return_attention_weights=True,
        attn_weights_dtype=jnp.float32, approx_reciprocal=False)
    jax.block_until_ready((out_v, out_l, attn_w))
    assert out_v.shape == (B, Tq, dv) and out_l.shape == (B, Tq, dl)
    assert jnp.allclose(out_v, ref_v, atol=5e-3, rtol=5e-3)
    assert jnp.allclose(out_l, ref_l, atol=5e-3, rtol=5e-3)
    assert jnp.allclose(attn_w, ref_attn, atol=5e-3, rtol=5e-3)

    # 2) Default fast path: bf16 MXU operands, no attention-weights writeback.
    out_v16, out_l16 = dot_product_attention(
        queries, keys, values, labels, weight, valid_lens)
    jax.block_until_ready((out_v16, out_l16))
    assert jnp.allclose(out_v16, ref_v, atol=6e-2, rtol=6e-2)
    assert jnp.allclose(out_l16, ref_l, atol=6e-2, rtol=6e-2)

    # 3) Flash-style Tk-tiled path (online softmax) on a longer key sequence.
    B2, Tq2, Tk2 = 2, 40, 1536
    k2q, k2k, k2v, k2l = jax.random.split(jax.random.PRNGKey(1), 4)
    q2 = jax.random.normal(k2q, (B2, Tq2, d), dtype=jnp.float32)
    kk2 = jax.random.normal(k2k, (B2, Tk2, d), dtype=jnp.float32)
    v2 = jax.random.normal(k2v, (B2, Tk2, dv), dtype=jnp.float32)
    l2 = jax.random.normal(k2l, (B2, Tk2, dl), dtype=jnp.float32)
    vlen2 = jnp.array([1000, 1536], dtype=jnp.int32)
    ref_v2, ref_l2, _ = _reference(q2, kk2, v2, l2, weight, vlen2)
    out_v2, out_l2 = dot_product_attention(q2, kk2, v2, l2, weight, vlen2,
                                           compute_dtype=jnp.bfloat16)
    jax.block_until_ready((out_v2, out_l2))
    assert jnp.allclose(out_v2, ref_v2, atol=3e-2, rtol=3e-2)
    assert jnp.allclose(out_l2, ref_l2, atol=3e-2, rtol=3e-2)

    print("KERNEL_OK")
</pallas_src>

<mosaic_0001>
module attributes {stable_mosaic.version = 11 : i64} {
  func.func @kernel(%arg0: i32, %arg1: i32, %arg2: memref<2xi32, #tpu.memory_space<smem>>, %arg3: memref<1x8x32xf32, #tpu.memory_space<vmem>>, %arg4: memref<1x8x32xf32, #tpu.memory_space<vmem>>, %arg5: memref<1x8x128xf32, #tpu.memory_space<vmem>>, %arg6: memref<1x8x128xf32, #tpu.memory_space<vmem>>, %arg7: memref<1x8x8xf32, #tpu.memory_space<vmem>>) attributes {dimension_semantics = [#tpu.dimension_semantics<parallel>, #tpu.dimension_semantics<arbitrary>], iteration_bounds = array<i64: 2, 1>, scalar_prefetch = 1 : i64, scratch_operands = 0 : i64, tpu.core_type = #tpu.core_type<tc>, window_params = [{transform_indices = @transform_0, window_bounds = array<i64: 1, 8, 32>}, {transform_indices = @transform_1, window_bounds = array<i64: 1, 8, 32>}, {transform_indices = @transform_2, window_bounds = array<i64: 1, 8, 128>}, {transform_indices = @transform_3, window_bounds = array<i64: 1, 8, 128>}, {transform_indices = @transform_4, window_bounds = array<i64: 1, 8, 8>}]} {
    %c0 = arith.constant 0 : index
    %c0_0 = arith.constant 0 : index
    %c0_1 = arith.constant 0 : index
    %0 = vector.load %arg3[%c0, %c0_0, %c0_1] : memref<1x8x32xf32, #tpu.memory_space<vmem>>, vector<1x8x32xf32>
    %1 = vector.shape_cast %0 : vector<1x8x32xf32> to vector<8x32xf32>
    %c0_2 = arith.constant 0 : index
    %c0_3 = arith.constant 0 : index
    %c0_4 = arith.constant 0 : index
    %2 = vector.load %arg4[%c0_2, %c0_3, %c0_4] : memref<1x8x32xf32, #tpu.memory_space<vmem>>, vector<1x8x32xf32>
    %3 = vector.shape_cast %2 : vector<1x8x32xf32> to vector<8x32xf32>
    %c0_5 = arith.constant 0 : index
    %c0_6 = arith.constant 0 : index
    %c0_7 = arith.constant 0 : index
    %4 = vector.load %arg5[%c0_5, %c0_6, %c0_7] : memref<1x8x128xf32, #tpu.memory_space<vmem>>, vector<1x8x128xf32>
    %5 = vector.shape_cast %4 : vector<1x8x128xf32> to vector<8x128xf32>
    %cst = arith.constant dense<0.000000e+00> : vector<8x8xf32>
    %6 = tpu.matmul %1, %3, %cst {dimension_numbers = #tpu.dot_dimension_numbers<[1], [1], [0], [0], [0, 0, 1, 0], [], []>} : vector<8x32xf32>, vector<8x32xf32>, vector<8x8xf32> -> vector<8x8xf32>
    %7 = arith.index_cast %arg0 : i32 to index
    %8 = memref.load %arg2[%7] : memref<2xi32, #tpu.memory_space<smem>>
    %9 = tpu.iota {dimensions = array<i32: 1>} : vector<8x8xi32>
    %10 = vector.broadcast %8 : i32 to vector<8x8xi32>
    %11 = arith.cmpi slt, %9, %10 : vector<8x8xi32>
    %cst_8 = arith.constant -1.000000e+06 : f32
    %12 = vector.broadcast %cst_8 : f32 to vector<8x8xf32>
    %13 = arith.select %11, %6, %12 : vector<8x8xi1>, vector<8x8xf32>
    %cst_9 = arith.constant dense<0xFF800000> : vector<8xf32>
    %14 = vector.multi_reduction <maximumf>, %13, %cst_9 [1] : vector<8x8xf32> to vector<8xf32>
    %15 = vector.shape_cast %14 : vector<8xf32> to vector<8x1xf32>
    %16 = vector.broadcast %15 : vector<8x1xf32> to vector<8x8xf32>
    %17 = arith.subf %13, %16 : vector<8x8xf32>
    %18 = math.exp %17 : vector<8x8xf32>
    %cst_10 = arith.constant dense<0.000000e+00> : vector<8xf32>
    %19 = vector.multi_reduction <add>, %18, %cst_10 [1] : vector<8x8xf32> to vector<8xf32>
    %20 = vector.shape_cast %19 : vector<8xf32> to vector<8x1xf32>
    %21 = tpu.reciprocal %20 : vector<8x1xf32> -> vector<8x1xf32>
    %22 = vector.broadcast %21 : vector<8x1xf32> to vector<8x8xf32>
    %23 = arith.mulf %18, %22 : vector<8x8xf32>
    %cst_11 = arith.constant dense<0.000000e+00> : vector<8x128xf32>
    %24 = tpu.matmul %23, %5, %cst_11 {dimension_numbers = #tpu.dot_dimension_numbers<[1], [0], [0], [1], [0, 0, 1, 1], [], []>} : vector<8x8xf32>, vector<8x128xf32>, vector<8x128xf32> -> vector<8x128xf32>
    %c0_12 = arith.constant 0 : index
    %c0_13 = arith.constant 0 : index
    %c0_14 = arith.constant 0 : index
    %25 = vector.load %arg6[%c0_12, %c0_13, %c0_14] : memref<1x8x128xf32, #tpu.memory_space<vmem>>, vector<1x8x128xf32>
    %26 = vector.shape_cast %25 : vector<1x8x128xf32> to vector<8x128xf32>
    %27 = vector.shape_cast %24 : vector<8x128xf32> to vector<1x8x128xf32>
    tpu.vector_store %arg6[%c0_12, %c0_13, %c0_14], %27 {strides = array<i32>} : memref<1x8x128xf32, #tpu.memory_space<vmem>>, vector<1x8x128xf32>,
    %c0_15 = arith.constant 0 : index
    %c0_16 = arith.constant 0 : index
    %c0_17 = arith.constant 0 : index
    %28 = vector.load %arg7[%c0_15, %c0_16, %c0_17] : memref<1x8x8xf32, #tpu.memory_space<vmem>>, vector<1x8x8xf32>
    %29 = vector.shape_cast %28 : vector<1x8x8xf32> to vector<8x8xf32>
    %30 = vector.shape_cast %23 : vector<8x8xf32> to vector<1x8x8xf32>
    tpu.vector_store %arg7[%c0_15, %c0_16, %c0_17], %30 {strides = array<i32>} : memref<1x8x8xf32, #tpu.memory_space<vmem>>, vector<1x8x8xf32>,
    return
  }
  func.func @transform_0(%arg0: i32, %arg1: i32, %arg2: memref<2xi32, #tpu.memory_space<smem>>) -> (i32, i32, i32) {
    %c0_i32 = arith.constant 0 : i32
    %c0_i32_0 = arith.constant 0 : i32
    return %arg0, %arg1, %c0_i32 : i32, i32, i32
  }
  func.func @transform_1(%arg0: i32, %arg1: i32, %arg2: memref<2xi32, #tpu.memory_space<smem>>) -> (i32, i32, i32) {
    %c0_i32 = arith.constant 0 : i32
    %c0_i32_0 = arith.constant 0 : i32
    %c0_i32_1 = arith.constant 0 : i32
    return %arg0, %c0_i32, %c0_i32_0 : i32, i32, i32
  }
  func.func @transform_2(%arg0: i32, %arg1: i32, %arg2: memref<2xi32, #tpu.memory_space<smem>>) -> (i32, i32, i32) {
    %c0_i32 = arith.constant 0 : i32
    %c0_i32_0 = arith.constant 0 : i32
    %c0_i32_1 = arith.constant 0 : i32
    return %arg0, %c0_i32, %c0_i32_0 : i32, i32, i32
  }
  func.func @transform_3(%arg0: i32, %arg1: i32, %arg2: memref<2xi32, #tpu.memory_space<smem>>) -> (i32, i32, i32) {
    %c0_i32 = arith.constant 0 : i32
    %c0_i32_0 = arith.constant 0 : i32
    return %arg0, %arg1, %c0_i32 : i32, i32, i32
  }
  func.func @transform_4(%arg0: i32, %arg1: i32, %arg2: memref<2xi32, #tpu.memory_space<smem>>) -> (i32, i32, i32) {
    %c0_i32 = arith.constant 0 : i32
    %c0_i32_0 = arith.constant 0 : i32
    return %arg0, %arg1, %c0_i32 : i32, i32, i32
  }
}

</mosaic_0001>

<bundles_post_ra>
// kernel: tpu_custom_call.1
= control target key start
LH: loop header
LB: loop body
LE: loop exit
PB: predicated region body
PF: predicated region fallthrough
CT: control target
= control target key end

     0   :  { %s940_s21 = smov [#allocation3]   ;;  %s1152_s0 = inlined_call_operand.hbm [shape: s32[2], index: 0, kind: input, shape index: {}]   ;;  %s1153_s1 = inlined_call_operand.hbm [shape: f32[2,8,32], index: 1, kind: input, shape index: {}]   ;;  %s1154_s2 = inlined_call_operand.hbm [shape: f32[2,8,32], index: 2, kind: input, shape index: {}]   ;;  %s1155_s3 = inlined_call_operand.hbm [shape: f32[2,8,128], index: 3, kind: input, shape index: {}]   ;;  %s1156_s4 = inlined_call_operand.hbm [shape: f32[2,8,128], index: 4, kind: output, shape index: {0}]   ;;  %s1157_s5 = inlined_call_operand.hbm [shape: f32[2,8,8], index: 5, kind: output, shape index: {1}]  }
   0x1   :  { %1161 = sst [smem:[#allocation22_spill]] %s1154_s2  ;;  %s12_s20 = sshll.u32 %s1152_s0, 4  ;;  %s13_s20 = int_to_ptr.hbm [resolvable:$true] %s12_s20 }
   0x2   :  { %15 = dma.hbm_to_smem %s13_s20, 16, %s940_s21, [#allocation2] }
   0x3   :  { %898 = dma.done.wait [#allocation2], 16 }
   0x4   :  { %899 = vsyncadd [#allocation2], 4294967280 }
   0x5   :  { %18 = sfence }
   0x6   :  { %19 = vsyncpa [#allocation5], 0 }
   0x7   :  { %21 = vsyncpa [#allocation5 + $0x1], 0 }
   0x8   :  { %22 = vsyncpa [#allocation8], 0 }
   0x9   :  { %24 = vsyncpa [#allocation8 + $0x1], 0 }
   0xa   :  { %25 = vsyncpa [#allocation6], 0 }
   0xb   :  { %27 = vsyncpa [#allocation6 + $0x1], 0 }
   0xc   :  { %28 = vsyncpa [#allocation12], 0 }
   0xd   :  { %30 = vsyncpa [#allocation12 + $0x1], 0  ;;  %s974_s22 = smov 0   ;;  %s976_s23 = smov 0  }
   0xe   :  { %s978_s24 = smov 0   ;;  %s980_s0 = smov 0  }
   0xf   :  { %s982_s25 = smov 0   ;;  %s984_s26 = smov 0  }
  0x10 LB: > { %1162 = sst [smem:[#allocation18_spill]] %s926_s24  ;;  %s1005_s27 = sadd.s32 4294967295, %s938_s26   ;;  %s938_s26 = sphi %s984_s26, %s36_s26   ;;  %s934_s25 = sphi %s982_s25, %s1176_s25   ;;  %s930_s0 = sphi %s980_s0, %s1175_s0   ;;  %s926_s24 = sphi %s978_s24, %s1174_s24   ;;  %s922_s23 = sphi %s976_s23, %s1178_s23   ;;  %s918_s22 = sphi %s974_s22, %s1177_s22  }
  0x11   : > { %1163 = sst [smem:[#allocation19_spill]] %s934_s25  ;;  %s610_s28 = sadd.s32 4294967294, %s938_s26  }
  0x12   : > { %s48_s29 = sadd.s32 1, %s934_s25  ;;  %s57_s30 = sadd.s32 1, %s926_s24 }
  0x13   : > { %p50_p0 = scmp.ge.s32.totalorder %s48_s29, 2  ;;  %p64_p1 = scmp.ne.s32.totalorder %s926_s24, %s922_s23 }
  0x14   : > { %p65_p2 = scmp.eq.s32.totalorder %s938_s26, 0  ;;  %p70_p3 = scmp.ne.s32.totalorder %s922_s23, %s918_s22 }
  0x15   : > { %s1180_s29 = smov (%p50_p0, %s48_s29), 0  ;;  %p71_p5 = scmp.eq.s32.totalorder %s1005_s27, 0 }
  0x16   : > { %1164 = sst [smem:[#allocation20_spill]] %s1180_s29  ;;  %p1017_p4 = por %p65_p2, %p64_p1 }
  0x17   : > { %s52_s7 = ssub.s32 %s934_s25, %s1180_s29  ;;  %p148_p6 = scmp.eq.s32.totalorder %s1005_s27, 1 }
  0x18   : > { %p55_p7 = scmp.eq.s32.totalorder %s52_s7, 0  ;;  %p1025_p8 = por %p71_p5, %p70_p3 }
  0x19   : > { %p1029_p9 = por %p148_p6, %p64_p1  ;;  %p154_p10 = scmp.eq.s32.totalorder %s610_s28, 1 }
  0x1a   : > { %s1034_s10 = scalar_select %p55_p7, %s926_s24, %s57_s30  }
  0x1b   : > { %p1036_p11 = por %p154_p10, %p70_p3  ;;  %p612_p12 = scmp.ge.s32.totalorder %s938_s26, 2 }
  0x1c   : > { %1168 = sst [smem:[#allocation21_spill]] %s1034_s10  ;;  %p661_p13 = scmp.lt.s32.totalorder %s938_s26, 2 }
  0x1d   : > { %s202_s12 = sand.u32 1, %s926_s24   ;;  %s614_s14 = sshll.u32 %s934_s25, 3 }
  0x1e   : > { %s613_s13 = sshll.u32 %s202_s12, 3  ;;  %p1046_p0 = pnand %p661_p13, %p1017_p4 }
  0x1f   : > { %s222_s16 = sand.u32 1, %s938_s26   ;;  %s1171_s2 = sld [smem:[#allocation22_spill]] }
  0x20   : > { %s226_s21 = scalar_lea.vmem [#allocation7], %s613_s13  ;;  %s223_s30 = scalar_lea.sflag [#allocation8], %s222_s16 }
  0x21   : > { %s234_s28 = sshll.u32 %s226_s21, 4  ;;  %p619_p1 = scmp.ge.s32.totalorder %s938_s26, 1  ;;  %s235_s28 = int_to_ptr.vmem [resolvable:$true] %s234_s28 }
  0x22   : > { %p258_p2 = scmp.lt.s32.totalorder %s938_s26, 3  ;;  %s211_s17 = scalar_lea.hbm %s1153_s1, %s614_s14 }
  0x23   : > { %s213_s18 = sshll.u32 %s211_s17, 4  ;;  %s203_s21 = scalar_lea.sflag [#allocation5], %s202_s12  ;;  %s214_s18 = int_to_ptr.hbm [resolvable:$true] %s213_s18 }
  0x24   : > { %p1058_p3 = pnand %p619_p1, %p258_p2  ;;  %s245_s10 = scalar_lea.vmem [#allocation9], %s613_s13 }
  0x25   : > { %s230_s19 = scalar_lea.hbm %s1171_s2, %s614_s14  ;;  %s253_s24 = sshll.u32 %s245_s10, 4  ;;  %s254_s24 = int_to_ptr.vmem [resolvable:$true] %s253_s24 }
  0x26   : > { %s232_s20 = sshll.u32 %s230_s19, 4  ;;  %s206_s19 = scalar_lea.vmem [#allocation4], %s613_s13  ;;  %s233_s20 = int_to_ptr.hbm [resolvable:$true] %s232_s20 }
  0x27   : > { %650 = dma.hbm_to_vmem [thread:$0]  (!%p1046_p0), %s233_s20, 128, %s235_s28, %s223_s30  }
  0x28   : > { %s215_s2 = sshll.u32 %s206_s19, 4  ;;  %s249_s28 = scalar_lea.hbm %s1155_s3, %s614_s14  ;;  %s216_s2 = int_to_ptr.vmem [resolvable:$true] %s215_s2 }
  0x29   : > { %647 = dma.hbm_to_vmem [thread:$0]  (!%p1046_p0), %s214_s18, 128, %s216_s2, %s203_s21  }
  0x2a   : > { %s251_s25 = sshll.u32 %s249_s28, 4  ;;  %262 = sbr.rel (%p1058_p3) target bundleno = 575 (0x23f), region = 32  ;;  %s252_s25 = int_to_ptr.hbm [resolvable:$true] %s251_s25 }
  0x2b   : > { %653 = dma.hbm_to_vmem [thread:$0]  (!%p1046_p0), %s252_s25, 128, %s254_s24, %s223_s30  }
  0x2c   : > { %s1075_s29 = sand.u32 (!%p1058_p3), 1, %s922_s23  }
  0x2d   : > { %s1078_s2 = sshll.u32 (!%p1058_p3), %s1075_s29, 3  ;;  %s265_s12 = scalar_lea.sflag (!%p1058_p3), [#allocation5], %s1075_s29 }
  0x2e   : > { %s268_s14 = scalar_lea.vmem (!%p1058_p3), [#allocation4], %s1078_s2 }
  0x2f   : > { %901 = dma.done.wait (%p1025_p8), %s265_s12, 128  }
  0x30   : > { %903 = vsyncadd (%p1025_p8), %s265_s12, 4294967168  ;;  %s274_s24 = sand.u32 1, %s1005_s27   ;;  %s278_s10 = scalar_lea.vmem [#allocation7], %s1078_s2 }
  0x31   : > { %s275_s25 = scalar_lea.sflag [#allocation8], %s274_s24 }
  0x32   : > { %905 = dma.done.wait (%p1025_p8), %s275_s25, 256  }
  0x33   : > { %907 = vsyncadd (%p1025_p8), %s275_s25, 4294967040  ;;  %vm332_vm0 = vcmask 261120   ;;  %v330_v0 = vld [vmem:[%s278_s10] sm:$0xff]  ;;  %v329_v1 = vld [vmem:[%s268_s14] sm:$0xff]  ;;  %s359_s13 = sld [smem:[#allocation3 + %s930_s0]]  ;;  %v360_v2 = vlaneseq  ;;  %vm365_vm2 = vcmask 64512  }
  0x34   : > { %625 = vmatpush.xpose.msk.msra.mxu0 %vm332_vm0, %v330_v0  ;;  %s288_s27 = scalar_lea.vmem [#allocation9], %s1078_s2  ;;  %s630_s8 = sshll.u32 %s930_s0, 3 }
  0x35   : > { %v361_v3 = vand.u32 127, %v360_v2  ;;  %v331_v13 = vld [vmem:[%s288_s27] sm:$0xff]  ;;  %s447_s6 = scalar_lea.hbm %s1157_s5, %s630_s8  ;;  %s328_s7 = scalar_lea.vmem [#allocation11], %s1078_s2 }
  0x36   : > { %408 = vmatpush.msra.mxu1 %v331_v13  ;;  %s449_s17 = sshll.u32 %s328_s7, 4  ;;  %s451_s18 = sshll.u32 %s447_s6, 4  ;;  %s450_s17 = int_to_ptr.vmem [resolvable:$true] %s449_s17  ;;  %s452_s18 = int_to_ptr.hbm [resolvable:$true] %s451_s18 }
  0x37   : > { %626 = vmatmul.msk.f32.vlgmr.msra.gmra.mxu0 %vm332_vm0, %v329_v1  ;;  %s421_s19 = scalar_lea.sflag [#allocation12], %s1075_s29  ;;  %s832_s0 = sshra.s32 %s452_s18, 4  ;;  %s833_s0 = int_to_ptr.hbm [resolvable:$true] %s832_s0 }
  0x38   : > { %s834_s21 = scalar_lea.hbm %s833_s0, 8  ;;  %s838_s28 = scalar_lea.hbm %s1157_s5, 16 }
  0x39   : > { %v362_v4 = vstv %s359_s13  ;;  %p835_p4 = scmp.ne.s32.totalorder %s833_s0, %s834_s21  ;;  %p839_p7 = scmp.lt.s32.totalorder %s833_s0, %s1157_s5 }
  0x3a   : > { %vm363_vm1 = vcmp.lt.s32.totalorder %v361_v3, %v362_v4  ;;  %p840_p8 = scmp.lt.s32.totalorder %s838_s28, %s834_s21 }
  0x3b   : > { %p836_p5 = pnand %p835_p4, %p1029_p9 }
  0x3c   : > { %p841_p10 = por %p840_p8, %p839_p7 }
  0x3d   : > { %p837_p6 = pneg %p836_p5 }
  0x3f   : > { %p842_p13 = pnand %p841_p10, %p837_p6 }
  0xb4   : > { %v356_v5 = vpop.f32.mrf.mxu0 }
  0xb5   : > { %v364_v6 = vsel %vm363_vm1, %v356_v5, -1000000.0 }
  0xb6   : > { %v366_v7 = vsel %vm365_vm2, %v364_v6, -inf }
  0xb7   : > { %367 = vmax.xlane.f32.xlu0 %v366_v7 }
 0x12a   : > { %v368_v8 = vpop.xlane.xlu0 %367 }
 0x12b   : > { %v369_v9 = vsub.f32 %v364_v6, %v368_v8 }
 0x12d   : > { %v370_v10 = vmul.f32 1.442695, %v369_v9 }
 0x12f   : > { %712 = vpow2.f32 %v370_v10 }
 0x135   : > { %v713_v11 = vpop.eup %712 }
 0x136   : > { %v372_v12 = vsel %vm365_vm2, %v713_v11, 0.0 }
 0x137   : > { %373 = vadd.xlane.f32.xlu0 %v372_v12 }
 0x1aa   : > { %v374_v14 = vpop.xlane.xlu0 %373 }
 0x1ab   : > { %714 = vrcp.f32 %v374_v14  ;;  %v386_v18 = vand.u32 2147483648, %v374_v14  ;;  %v384_v20 = vand.u32 2147483647, %v374_v14  ;;  %vm380_vm4 = vweird.f32 %v374_v14 }
 0x1ad   : > { %v387_v22 = vor.u32 1.1754944e-38, %v386_v18  ;;  %vm385_vm6 = vcmp.eq.f32.partialorder %v384_v20, 8.507059e+37 }
 0x1b1   : > { %v715_v15 = vpop.eup %714 }
 0x1b2   : > { %v376_v16 = vmul.f32 %v715_v15, %v374_v14  ;;  %vm381_vm3 = vweird.f32 %v715_v15 }
 0x1b3   : > { %vm382_vm5 = vmor %vm380_vm4, %vm381_vm3 }
 0x1b4   : > { %v377_v17 = vsub.f32 1.0, %v376_v16 }
 0x1b6   : > { %v378_v19 = vmul.f32 %v715_v15, %v377_v17 }
 0x1b8   : > { %v379_v21 = vadd.f32 %v715_v15, %v378_v19 }
 0x1ba   : > { %v383_v23 = vsel %vm382_vm5, %v715_v15, %v379_v21 }
 0x1bb   : > { %v388_v24 = vsel %vm385_vm6, %v387_v22, %v383_v23 }
 0x1bc   : > { %v389_v25 = vmul.f32 %v713_v11, %v388_v24 }
 0x1be   : > { %627 = vmatmul.msk.f32.vlgmr.msra.gmra.mxu1 %vm365_vm2, %v389_v25  ;;  %414 = vst.msk [vmem:[%s328_s7] sm:$0xff] %vm365_vm2, %v389_v25 }
 0x1bf   : > { %845 = shalt.err (!%p842_p13)
}
 0x1c0   : > { %641 = dma.vmem_to_hbm [thread:$0]  (%p1029_p9), %s450_s17, 128, %s452_s18, %s421_s19  }
 0x1c1   : > { %s432_s10 = scalar_lea.hbm %s1156_s4, %s630_s8  ;;  %s321_s13 = scalar_lea.vmem [#allocation10], %s1078_s2 }
 0x1c2   : > { %s434_s27 = sshll.u32 %s321_s13, 4  ;;  %s436_s15 = sshll.u32 %s432_s10, 4  ;;  %s435_s27 = int_to_ptr.vmem [resolvable:$true] %s434_s27  ;;  %s437_s15 = int_to_ptr.hbm [resolvable:$true] %s436_s15 }
 0x1c3   : > { %s416_s30 = scalar_lea.sflag [#allocation6], %s1075_s29  ;;  %s860_s6 = sshra.s32 %s437_s15, 4  ;;  %s861_s6 = int_to_ptr.hbm [resolvable:$true] %s860_s6 }
 0x1c4   : > { %s862_s7 = scalar_lea.hbm %s861_s6, 8  ;;  %s866_s19 = scalar_lea.hbm %s1156_s4, 16 }
 0x1c5   : > { %p863_p0 = scmp.ne.s32.totalorder %s861_s6, %s862_s7  ;;  %p867_p3 = scmp.lt.s32.totalorder %s861_s6, %s1156_s4 }
 0x1c6   : > { %p868_p4 = scmp.lt.s32.totalorder %s866_s19, %s862_s7 }
 0x1c7   : > { %p864_p1 = pnand %p863_p0, %p1029_p9 }
 0x1c8   : > { %p869_p5 = por %p868_p4, %p867_p3 }
 0x1c9   : > { %p865_p2 = pneg %p864_p1 }
 0x1cb   : > { %p870_p6 = pnand %p869_p5, %p865_p2 }
 0x23b   : > { %v410_v26 = vpop.f32.mrf.mxu1 }
 0x23c   : > { %413 = vst [vmem:[%s321_s13] sm:$0xff] %v410_v26 }
 0x23d   : > { %873 = shalt.err (!%p870_p6)
}
 0x23e   : > { %640 = dma.vmem_to_hbm [thread:$0]  (%p1029_p9), %s435_s27, 128, %s437_s15, %s416_s30  }
 0x23f PF: > { %s463_s29 = sand.u32 1, %s918_s22   ;;  %p655_p7 = pnand %p612_p12, %p1036_p11 }
 0x240   : > { %s464_s0 = scalar_lea.sflag [#allocation6], %s463_s29 }
 0x241   : > { %p656_p8 = pneg %p655_p7 }
 0x243   : > { %909 = dma.done.wait (%p656_p8), %s464_s0, 128  }
 0x244   : > { %911 = vsyncadd (%p656_p8), %s464_s0, 4294967168  ;;  %s474_s21 = scalar_lea.sflag [#allocation12], %s463_s29 }
 0x245   : > { %913 = dma.done.wait (%p656_p8), %s474_s21, 128  }
 0x246   : > { %915 = vsyncadd (%p656_p8), %s474_s21, 4294967168  ;;  %s36_s26 = sadd.s32 1, %s938_s26   ;;  %s1173_s9 = sld [smem:[#allocation18_spill]] }
 0x247   : > { %p33_p10 = scmp.ge.s32.totalorder %s36_s26, 4   ;;  %s1174_s24 = sld [smem:[#allocation21_spill]] }
 0x248   : > { %s1175_s0 = sld [smem:[#allocation19_spill]]  ;;  %s1177_s22 = smov %s922_s23 }
 0x249   : > { %s1176_s25 = sld [smem:[#allocation20_spill]]  ;;  %35 = sbr.rel (!%p33_p10) target bundleno = 16 (0x10), region = 118 }
 0x24c   : > { %s1178_s23 = smov %s1173_s9 }
 0x24e   :  { %480 = vsyncpa [#allocation5], 1 }
 0x24f   :  { %482 = vsyncpa [#allocation5 + $0x1], 1 }
 0x250   :  { %483 = vsyncpa [#allocation8], 1 }
 0x251   :  { %485 = vsyncpa [#allocation8 + $0x1], 1 }
 0x252   :  { %486 = vsyncpa [#allocation6], 1 }
 0x253   :  { %488 = vsyncpa [#allocation6 + $0x1], 1 }
 0x254   :  { %489 = vsyncpa [#allocation12], 1 }
 0x255   :  { %491 = vsyncpa [#allocation12 + $0x1], 1 }

</bundles_post_ra>
